<compile_context>
chip_gen: v5e
topology: v5e:2x2
jax: 0.10.0
libtpu: 0.0.40
codegen_flags: <defaults>
</compile_context>

<pallas_src>
import jax
import jax.numpy as jnp
from jax.experimental import pallas as pl
from jax.experimental.pallas import tpu as pltpu

_LANE = 128
_SUBLANE = 8


def _cdiv(a, b):
    return -(-a // b)


def _make_neg_mean_kernel(n_true: int, tile_rows: int):
    inv_n = 1.0 / float(n_true)
    groups = tile_rows // _SUBLANE

    def kernel(x_ref, out_ref, acc_ref):
        k = pl.program_id(1)

        @pl.when(k == 0)
        def _init():
            acc_ref[...] = jnp.zeros_like(acc_ref)

        # Hot loop: upcast on the vreg, fold the tile sublane-wise into an
        # (8, 128) accumulator (vreg adds only, no cross-lane movement).
        x = x_ref[...].astype(jnp.float32)
        acc_ref[...] += x.reshape(groups, _SUBLANE, _LANE).sum(axis=0)

        @pl.when(k == pl.num_programs(1) - 1)
        def _finalize():
            # One cross-lane/sublane reduce per core slice, only at the end.
            partial = -(jnp.sum(acc_ref[...]) * inv_n)  # -sum(this slice) / N
            out_ref[...] = jnp.full(out_ref.shape, partial, dtype=jnp.float32)

    return kernel


def nll_loss_cnf(logp_x, *, max_tile_rows: int = 2048, num_core_splits: int = 2):
    """Pallas implementation of NLLLoss_CNF.forward: {'loss': -mean(logp_x)}."""
    n = logp_x.size
    assert n > 0, "mean of an empty tensor is undefined"

    # ---- lay the data out as a lane-dense (rows, 128) slab -----------------
    rows = _cdiv(n, _LANE)
    rows_per_core = _cdiv(rows, num_core_splits)
    # Balance tile rows across grid steps to minimize zero-padding waste.
    num_k = _cdiv(rows_per_core, max_tile_rows)
    tile_rows = _cdiv(_cdiv(rows_per_core, num_k), _SUBLANE) * _SUBLANE
    tile_rows = max(tile_rows, _SUBLANE)
    num_k = _cdiv(rows_per_core, tile_rows)
    rows_padded = num_core_splits * num_k * tile_rows
    n_padded = rows_padded * _LANE

    flat = logp_x.reshape(-1)                    # keep native dtype (no f32 HBM copy)
    if n_padded != n:
        flat = jnp.pad(flat, (0, n_padded - n))  # zeros are exact for a sum
    x2d = flat.reshape(rows_padded, _LANE)

    kernel = _make_neg_mean_kernel(n, tile_rows)

    out = pl.pallas_call(
        kernel,
        out_shape=jax.ShapeDtypeStruct((num_core_splits * _SUBLANE, _LANE),
                                       jnp.float32),
        grid_spec=pltpu.PrefetchScalarGridSpec(
            num_scalar_prefetch=0,
            grid=(num_core_splits, num_k),
            in_specs=[
                pl.BlockSpec((tile_rows, _LANE),
                             lambda c, k: (c * num_k + k, 0)),
            ],
            out_specs=pl.BlockSpec((_SUBLANE, _LANE), lambda c, k: (c, 0)),
            scratch_shapes=[pltpu.VMEM((_SUBLANE, _LANE), jnp.float32)],
        ),
        compiler_params=pltpu.CompilerParams(
            dimension_semantics=("parallel", "arbitrary"),
            vmem_limit_bytes=32 * 1024 * 1024,
        ),
        cost_estimate=pl.CostEstimate(
            flops=n_padded,                       # one add per element
            transcendentals=0,
            bytes_accessed=n_padded * jnp.dtype(logp_x.dtype).itemsize
                           + num_core_splits * _SUBLANE * _LANE * 4,
        ),
    )(x2d)

    # Combine the per-core partials (each already carries -sum/N).
    loss = jnp.sum(out[::_SUBLANE, 0])
    return {"loss": loss}


def _reference(logp_x):
    return {"loss": -jnp.mean(logp_x)}


if __name__ == "__main__":
    key = jax.random.PRNGKey(0)
    k1, k2 = jax.random.split(key)

    # Small shape consistent with the module: per-sample log-likelihoods.
    logp_small = jax.random.normal(k1, (256,), dtype=jnp.float32)
    out = nll_loss_cnf(logp_small)
    out = jax.tree_util.tree_map(jax.block_until_ready, out)
    ref = _reference(logp_small)
    assert jnp.allclose(out["loss"], ref["loss"], rtol=1e-5, atol=1e-5), (
        out["loss"], ref["loss"])

    # Exercise the multi-tile accumulation path (several k steps per core).
    logp_multi = jax.random.normal(k2, (4, 2048), dtype=jnp.float32)
    out2 = nll_loss_cnf(logp_multi, max_tile_rows=8)
    out2 = jax.tree_util.tree_map(jax.block_until_ready, out2)
    ref2 = _reference(logp_multi)
    assert jnp.allclose(out2["loss"], ref2["loss"], rtol=1e-5, atol=1e-5), (
        out2["loss"], ref2["loss"])

    print("KERNEL_OK")
</pallas_src>

<mosaic_0001>
module attributes {stable_mosaic.version = 11 : i64} {
  func.func @kernel(%arg0: i32, %arg1: i32, %arg2: memref<8x128xf32, #tpu.memory_space<vmem>>, %arg3: memref<8x128xf32, #tpu.memory_space<vmem>>, %arg4: memref<8x128xf32, #tpu.memory_space<vmem>>) attributes {dimension_semantics = [#tpu.dimension_semantics<parallel>, #tpu.dimension_semantics<arbitrary>], iteration_bounds = array<i64: 2, 1>, scalar_prefetch = 0 : i64, scratch_operands = 1 : i64, tpu.core_type = #tpu.core_type<tc>, window_params = [{transform_indices = @transform_0, window_bounds = array<i64: 8, 128>}, {transform_indices = @transform_1, window_bounds = array<i64: 8, 128>}]} {
    %c0_i32 = arith.constant 0 : i32
    %0 = arith.cmpi eq, %arg1, %c0_i32 : i32
    %1 = arith.extui %0 : i1 to i32
    %c0_i32_0 = arith.constant 0 : i32
    %2 = arith.cmpi ne, %1, %c0_i32_0 : i32
    scf.if %2 {
      %cst_8 = arith.constant 0.000000e+00 : f32
      %12 = vector.broadcast %cst_8 : f32 to vector<8x128xf32>
      %c0_9 = arith.constant 0 : index
      %c0_10 = arith.constant 0 : index
      %13 = vector.load %arg4[%c0_9, %c0_10] : memref<8x128xf32, #tpu.memory_space<vmem>>, vector<8x128xf32>
      tpu.vector_store %arg4[%c0_9, %c0_10], %12 {strides = array<i32>} : memref<8x128xf32, #tpu.memory_space<vmem>>, vector<8x128xf32>,
    } else {
    }
    %c0 = arith.constant 0 : index
    %c0_1 = arith.constant 0 : index
    %3 = vector.load %arg2[%c0, %c0_1] : memref<8x128xf32, #tpu.memory_space<vmem>>, vector<8x128xf32>
    %c0_2 = arith.constant 0 : index
    %c0_3 = arith.constant 0 : index
    %4 = vector.load %arg4[%c0_2, %c0_3] : memref<8x128xf32, #tpu.memory_space<vmem>>, vector<8x128xf32>
    %5 = vector.shape_cast %3 : vector<8x128xf32> to vector<1x8x128xf32>
    %cst = arith.constant dense<0.000000e+00> : vector<8x128xf32>
    %6 = vector.multi_reduction <add>, %5, %cst [0] : vector<1x8x128xf32> to vector<8x128xf32>
    %7 = arith.addf %4, %6 : vector<8x128xf32>
    %c0_4 = arith.constant 0 : index
    %c0_5 = arith.constant 0 : index
    %8 = vector.load %arg4[%c0_4, %c0_5] : memref<8x128xf32, #tpu.memory_space<vmem>>, vector<8x128xf32>
    tpu.vector_store %arg4[%c0_4, %c0_5], %7 {strides = array<i32>} : memref<8x128xf32, #tpu.memory_space<vmem>>, vector<8x128xf32>,
    %c0_i32_6 = arith.constant 0 : i32
    %9 = arith.cmpi eq, %arg1, %c0_i32_6 : i32
    %10 = arith.extui %9 : i1 to i32
    %c0_i32_7 = arith.constant 0 : i32
    %11 = arith.cmpi ne, %10, %c0_i32_7 : i32
    scf.if %11 {
      %c0_8 = arith.constant 0 : index
      %c0_9 = arith.constant 0 : index
      %12 = vector.load %arg4[%c0_8, %c0_9] : memref<8x128xf32, #tpu.memory_space<vmem>>, vector<8x128xf32>
      %13 = vector.shape_cast %12 : vector<8x128xf32> to vector<1x8x128xf32>
      %cst_10 = arith.constant dense<0.000000e+00> : vector<1xf32>
      %14 = vector.multi_reduction <add>, %13, %cst_10 [1, 2] : vector<1x8x128xf32> to vector<1xf32>
      %15 = vector.shape_cast %14 : vector<1xf32> to vector<1x1x1xf32>
      %16 = vector.extract %15[0, 0, 0] : f32 from vector<1x1x1xf32>
      %cst_11 = arith.constant 3.906250e-03 : f32
      %17 = arith.mulf %16, %cst_11 : f32
      %cst_12 = arith.constant 0.000000e+00 : f32
      %18 = arith.subf %cst_12, %17 : f32
      %19 = vector.broadcast %18 : f32 to vector<8x128xf32>
      %c0_13 = arith.constant 0 : index
      %c0_14 = arith.constant 0 : index
      %20 = vector.load %arg3[%c0_13, %c0_14] : memref<8x128xf32, #tpu.memory_space<vmem>>, vector<8x128xf32>
      tpu.vector_store %arg3[%c0_13, %c0_14], %19 {strides = array<i32>} : memref<8x128xf32, #tpu.memory_space<vmem>>, vector<8x128xf32>,
    } else {
    }
    return
  }
  func.func @transform_0(%arg0: i32, %arg1: i32) -> (i32, i32) {
    %c1_i32 = arith.constant 1 : i32
    %0 = arith.muli %arg0, %c1_i32 : i32
    %1 = arith.addi %0, %arg1 : i32
    %c0_i32 = arith.constant 0 : i32
    %c0_i32_0 = arith.constant 0 : i32
    return %1, %c0_i32 : i32, i32
  }
  func.func @transform_1(%arg0: i32, %arg1: i32) -> (i32, i32) {
    %c0_i32 = arith.constant 0 : i32
    %c0_i32_0 = arith.constant 0 : i32
    return %arg0, %c0_i32 : i32, i32
  }
}

</mosaic_0001>

<bundles_post_ra>
// kernel: tpu_custom_call.1
= control target key start
LH: loop header
LB: loop body
LE: loop exit
PB: predicated region body
PF: predicated region fallthrough
CT: control target
= control target key end

     0   :  { %6 = vsyncpa [#allocation4], 0  ;;  %s593_s0 = inlined_call_operand.hbm [shape: f32[16,128], index: 0, kind: input, shape index: {}]   ;;  %s594_s1 = inlined_call_operand.hbm [shape: f32[16,128], index: 1, kind: output, shape index: {}]  }
   0x1   :  { %8 = vsyncpa [#allocation4 + $0x1], 0 }
   0x2   :  { %9 = vsyncpa [#allocation5], 0 }
   0x3   :  { %11 = vsyncpa [#allocation5 + $0x1], 0  ;;  %s473_s6 = smov 0   ;;  %s475_s7 = smov 0  }
   0x4   :  { %s477_s8 = smov 0   ;;  %s479_s9 = smov 0  }
   0x5   :  { %s481_s10 = smov 0   ;;  %s483_s11 = smov 0  }
   0x6 LB: > { %s272_s12 = sadd.s32 4294967295, %s461_s11   ;;  %s273_s13 = sadd.s32 4294967294, %s461_s11   ;;  %s461_s11 = sphi %s483_s11, %s17_s11   ;;  %s457_s10 = sphi %s481_s10, %s603_s10   ;;  %s453_s9 = sphi %s479_s9, %s602_s9   ;;  %s449_s8 = sphi %s477_s8, %s601_s8   ;;  %s445_s7 = sphi %s475_s7, %s600_s7   ;;  %s441_s6 = sphi %s473_s6, %s599_s6  }
   0x7   : > { %s29_s14 = sadd.s32 1, %s457_s10  ;;  %s38_s15 = sadd.s32 1, %s449_s8 }
   0x8   : > { %p31_p0 = scmp.ge.s32.totalorder %s29_s14, 2  ;;  %p45_p1 = scmp.ne.s32.totalorder %s449_s8, %s445_s7 }
   0x9   : > { %p46_p2 = scmp.eq.s32.totalorder %s461_s11, 0  ;;  %p51_p3 = scmp.ne.s32.totalorder %s445_s7, %s441_s6 }
   0xa   : > { %s605_s14 = smov (%p31_p0, %s29_s14), 0  ;;  %p52_p5 = scmp.eq.s32.totalorder %s272_s12, 0 }
   0xb   : > { %p514_p4 = por %p46_p2, %p45_p1  ;;  %s35_s17 = ssub.s32 %s457_s10, %s605_s14 }
   0xc   : > { %p75_p6 = scmp.eq.s32.totalorder %s272_s12, 1  ;;  %p36_p7 = scmp.eq.s32.totalorder %s35_s17, 0 }
   0xd   : > { %p520_p8 = por %p52_p5, %p51_p3  ;;  %p81_p10 = scmp.eq.s32.totalorder %s273_s13, 1 }
   0xe   : > { %p524_p9 = por %p75_p6, %p45_p1  ;;  %p275_p12 = scmp.ge.s32.totalorder %s461_s11, 2 }
   0xf   : > { %s529_s20 = scalar_select %p36_p7, %s449_s8, %s38_s15  }
  0x10   : > { %p531_p11 = por %p81_p10, %p51_p3  ;;  %p299_p13 = scmp.lt.s32.totalorder %s461_s11, 2 }
  0x11   : > { %s101_s22 = sand.u32 1, %s449_s8   ;;  %s277_s24 = sshll.u32 %s457_s10, 3 }
  0x12   : > { %s276_s23 = sshll.u32 %s101_s22, 3  ;;  %s110_s27 = scalar_lea.hbm %s593_s0, %s277_s24 }
  0x13   : > { %s105_s28 = scalar_lea.vmem [#allocation3], %s276_s23  ;;  %s112_s30 = sshll.u32 %s110_s27, 4  ;;  %s113_s30 = int_to_ptr.hbm [resolvable:$true] %s112_s30 }
  0x14   : > { %s114_s29 = sshll.u32 %s105_s28, 4  ;;  %p292_p0 = pnand %p299_p13, %p514_p4  ;;  %s115_s29 = int_to_ptr.vmem [resolvable:$true] %s114_s29 }
  0x15   : > { %p278_p1 = scmp.ge.s32.totalorder %s461_s11, 1  ;;  %p119_p2 = scmp.lt.s32.totalorder %s461_s11, 3 }
  0x16   : > { %s102_s2 = scalar_lea.sflag [#allocation4], %s101_s22 }
  0x17   : > { %294 = dma.hbm_to_vmem [thread:$0]  (!%p292_p0), %s113_s30, 128, %s115_s29, %s102_s2  }
  0x18   : > { %p120_p3 = pnand %p278_p1, %p119_p2 }
  0x19   : > { %s547_s3 = sand.u32 (!%p120_p3), 1, %s445_s7  }
  0x1a   : > { %123 = sbr.rel (%p120_p3) target bundleno = 219 (0xdb), region = 24  ;;  %s279_s4 = sshll.u32 (!%p120_p3), %s547_s3, 3 }
  0x1b   : > { %s126_s5 = scalar_lea.sflag (!%p120_p3), [#allocation4], %s547_s3  ;;  %s129_s12 = scalar_lea.vmem (!%p120_p3), [#allocation3], %s279_s4 }
  0x1f   : > { %432 = dma.done.wait (%p520_p8), %s126_s5, 128  }
  0x20   : > { %434 = vsyncadd (%p520_p8), %s126_s5, 4294967168  ;;  %v155_v0 = vld [vmem:[%s129_s12] sm:$0xff]  ;;  %s282_s13 = sshll.u32 %s453_s9, 3  ;;  %s148_s22 = scalar_lea.vmem [#allocation6], %s279_s4 }
  0x21   : > { %164 = vadd.xlane.f32.xlu0 %v155_v0  ;;  %s188_s17 = scalar_lea.hbm %s594_s1, %s282_s13  ;;  %s190_s23 = sshll.u32 %s148_s22, 4  ;;  %s191_s23 = int_to_ptr.vmem [resolvable:$true] %s190_s23 }
  0x22   : > { %s192_s25 = sshll.u32 %s188_s17, 4  ;;  %s178_s27 = scalar_lea.sflag [#allocation5], %s547_s3  ;;  %s193_s25 = int_to_ptr.hbm [resolvable:$true] %s192_s25 }
  0x23   : > { %s393_s28 = sshra.s32 %s193_s25, 4  ;;  %s399_s2 = scalar_lea.hbm %s594_s1, 16  ;;  %s394_s28 = int_to_ptr.hbm [resolvable:$true] %s393_s28 }
  0x24   : > { %s395_s29 = scalar_lea.hbm %s394_s28, 8  ;;  %p400_p7 = scmp.lt.s32.totalorder %s394_s28, %s594_s1 }
  0x25   : > { %p396_p4 = scmp.ne.s32.totalorder %s394_s28, %s395_s29  ;;  %p401_p8 = scmp.lt.s32.totalorder %s399_s2, %s395_s29 }
  0x27   : > { %p397_p5 = pnand %p396_p4, %p524_p9  ;;  %p402_p10 = por %p401_p8, %p400_p7 }
  0x29   : > { %p398_p6 = pneg %p397_p5 }
  0x2b   : > { %p403_p13 = pnand %p402_p10, %p398_p6 }
  0x94   : > { %v165_v1 = vpop.xlane.xlu0 %164 }
  0x95   : > { %v166_v2 = vrot.slane %v165_v1, 4 }
  0x97   : > { %v167_v3 = vadd.f32 %v166_v2, %v165_v1 }
  0x99   : > { %v168_v4 = vrot.slane %v167_v3, 2 }
  0x9b   : > { %v169_v5 = vadd.f32 %v168_v4, %v167_v3 }
  0x9d   : > { %v170_v6 = vrot.slane %v169_v5, 1 }
  0x9f   : > { %v171_v7 = vadd.f32 %v170_v6, %v169_v5 }
  0xa1   : > { %285 = vpush %v171_v7 }
  0xd2   : > { %s286_s18 = spop %285 }
  0xd3   : > { %s173_s24 = smul.f32 0.00390625, %s286_s18 }
  0xd5   : > { %s174_s26 = ssub.f32 0.0, %s173_s24 }
  0xd7   : > { %v175_v8 = vstv %s174_s26 }
  0xd8   : > { %176 = vst [vmem:[%s148_s22] sm:$0xff] %v175_v8 }
  0xd9   : > { %406 = shalt.err (!%p403_p13)
}
  0xda   : > { %289 = dma.vmem_to_hbm [thread:$0]  (%p524_p9), %s191_s23, 128, %s193_s25, %s178_s27  }
  0xdb PF: > { %s204_s3 = sand.u32 1, %s441_s6   ;;  %p296_p0 = pnand %p275_p12, %p531_p11 }
  0xdc   : > { %s205_s12 = scalar_lea.sflag [#allocation5], %s204_s3 }
  0xdd   : > { %p297_p1 = pneg %p296_p0 }
  0xdf   : > { %436 = dma.done.wait (%p297_p1), %s205_s12, 128  }
  0xe0   : > { %438 = vsyncadd (%p297_p1), %s205_s12, 4294967168  ;;  %s17_s11 = sadd.s32 1, %s461_s11   ;;  %s599_s6 = smov %s445_s7 }
  0xe1   : > { %p14_p2 = scmp.ge.s32.totalorder %s17_s11, 4   ;;  %s600_s7 = smov %s449_s8 }
  0xe2   : > { %s601_s8 = smov %s529_s20  ;;  %s602_s9 = smov %s457_s10 }
  0xe3   : > { %s603_s10 = smov %s605_s14  ;;  %16 = sbr.rel (!%p14_p2) target bundleno = 6 (0x6), region = 77 }
  0xe8   :  { %211 = vsyncpa [#allocation4], 1 }
  0xe9   :  { %213 = vsyncpa [#allocation4 + $0x1], 1 }
  0xea   :  { %214 = vsyncpa [#allocation5], 1 }
  0xeb   :  { %216 = vsyncpa [#allocation5 + $0x1], 1 }

</bundles_post_ra>
